<compile_context>
chip_gen: v6e
topology: v6e:2x2x1
jax: 0.10.0
libtpu: 0.0.40
codegen_flags: <defaults>
</compile_context>

<pallas_src>
import jax
import jax.numpy as jnp
from jax.experimental import pallas as pl
from jax.experimental.pallas import tpu as pltpu


def dwt_kernel(x_ref, m_ref, o_ref):
    # x_ref: (1, bc, bh, 2*W); last dim holds [even row | odd row] (columns
    #        still interleaved).
    # m_ref: (W, W) constant; r @ M = [ (even_col+odd_col)/2 | (odd_col-even_col)/2 ].
    # o_ref: (1, 4, bc, bh, Wh), subband order [LL, HL, LH, HH].
    wh = o_ref.shape[-1]
    w = 2 * wh
    _, bc, bh, _ = x_ref.shape
    rows = bc * bh

    m = m_ref[...]

    # Contiguous lane slices of the ref (static -> view), then a layout-trivial
    # merge of the leading dims (bh is a multiple of the sublane pack, or bc==1).
    re = x_ref[:, :, :, 0:w].reshape(rows, w)      # even rows
    ro = x_ref[:, :, :, w:2 * w].reshape(rows, w)  # odd rows

    # Column-direction Haar (incl. the 1/2 scaling) on the MXU, f32 accumulate.
    e = jnp.dot(re, m, preferred_element_type=jnp.float32)  # [se | de]
    o = jnp.dot(ro, m, preferred_element_type=jnp.float32)  # [so | do]

    se, de = e[:, :wh], e[:, wh:]
    so, do = o[:, :wh], o[:, wh:]

    out_dt = o_ref.dtype
    shp = (1, bc, bh, wh)
    # Row-direction butterfly (pure VPU adds) + cast on store.
    o_ref[:, 0, :, :, :] = (se + so).reshape(shp).astype(out_dt)  # LL
    o_ref[:, 1, :, :, :] = (de + do).reshape(shp).astype(out_dt)  # HL
    o_ref[:, 2, :, :, :] = (so - se).reshape(shp).astype(out_dt)  # LH
    o_ref[:, 3, :, :, :] = (do - de).reshape(shp).astype(out_dt)  # HH


def _haar_col_matrix(w, dtype):
    """(W, W) matrix M s.t. row @ M = [(even+odd)/2 | (odd-even)/2] per col pair."""
    wh = w // 2
    r = jnp.arange(w)[:, None]   # input (interleaved) column index
    c = jnp.arange(w)[None, :]   # output index: [sum part | diff part]
    m_sum = jnp.where((c < wh) & ((r // 2) == c), 0.5, 0.0)
    m_diff = jnp.where((c >= wh) & ((r // 2) == (c - wh)),
                       jnp.where(r % 2 == 1, 0.5, -0.5), 0.0)
    return (m_sum + m_diff).astype(dtype)


def dwt_forward(x, *, target_block_bytes=4 << 20):
    """Pallas implementation of dwt_init / DWT.forward for NCHW input."""
    N, C, H, W = x.shape
    assert H % 2 == 0 and W % 2 == 0, "H and W must be even"
    Hh, Wh = H // 2, W // 2
    W2 = 2 * W
    itemsize = jnp.dtype(x.dtype).itemsize
    # Sub-32-bit dtypes pack rows along sublanes: round row tiles accordingly.
    row_mult = max(8, 32 // itemsize)

    # FREE view (adjacent-dim split+merge only, no data movement):
    # (N,C,H,W) -> (N,C,Hh,2,W) -> (N,C,Hh,2W); last dim = [even row | odd row].
    xr = x.reshape(N, C, Hh, W2)
    m = _haar_col_matrix(W, x.dtype)

    # ---- tile sizing -------------------------------------------------------
    cdiv = lambda a, b: -(-a // b)
    row_bytes = W2 * itemsize
    target_rows = max(1, target_block_bytes // row_bytes)

    if Hh < row_mult:
        # Degenerate tiny-image case: keep bc == 1 so the in-kernel merge of
        # (bc, bh) rows stays layout-trivial.
        bh, bc = Hh, 1
    else:
        bh_cap = min(Hh, max(target_rows, row_mult))
        bh = max(row_mult, (bh_cap // row_mult) * row_mult)  # multiple of row_mult
        bc = int(max(1, min(C, target_rows // bh)))

    # Keep at least 2 grid steps so both v7x TensorCores (megacore) get work.
    if N * cdiv(C, bc) * cdiv(Hh, bh) < 2:
        if Hh > row_mult:
            nh = cdiv(cdiv(Hh, 2), row_mult) * row_mult
            if nh < Hh:
                bh = nh
        elif C > 1:
            bc = max(1, C // 2)

    bh, bc = int(bh), int(bc)
    grid = (N, cdiv(C, bc), cdiv(Hh, bh))

    # ---- VMEM budget / cost hint ------------------------------------------
    tile_bytes = bc * bh * W2 * itemsize            # input tile == output tile
    m_bytes = W * W * itemsize
    # 2x double-buffered in + out (= 4 tiles) + intermediates headroom + M.
    vmem_limit = int(min(56 << 20, max(32 << 20, 8 * tile_bytes + 2 * m_bytes)))

    cost = pl.CostEstimate(
        flops=2 * x.size * W + 4 * x.size,
        transcendentals=0,
        bytes_accessed=2 * x.size * itemsize + m_bytes,
    )

    out5 = pl.pallas_call(
        dwt_kernel,
        out_shape=jax.ShapeDtypeStruct((N, 4, C, Hh, Wh), x.dtype),
        grid=grid,
        in_specs=[
            pl.BlockSpec((1, bc, bh, W2), lambda n, ci, hi: (n, ci, hi, 0)),
            pl.BlockSpec((W, W), lambda n, ci, hi: (0, 0)),
        ],
        out_specs=pl.BlockSpec((1, 4, bc, bh, Wh),
                               lambda n, ci, hi: (n, 0, ci, hi, 0)),
        compiler_params=pltpu.CompilerParams(
            dimension_semantics=("parallel", "parallel", "parallel"),
            vmem_limit_bytes=vmem_limit),
        cost_estimate=cost,
    )(xr, m)

    # (N, 4, C, Hh, Wh) -> (N, 4C, Hh, Wh): adjacent-dim merge, free; matches
    # torch.cat((LL, HL, LH, HH), dim=1) channel ordering.
    return out5.reshape(N, 4 * C, Hh, Wh)


def dwt_reference(x):
    """Pure-JAX reference matching the PyTorch dwt_init exactly."""
    x01 = x[:, :, 0::2, :] / 2
    x02 = x[:, :, 1::2, :] / 2
    x1 = x01[:, :, :, 0::2]
    x2 = x02[:, :, :, 0::2]
    x3 = x01[:, :, :, 1::2]
    x4 = x02[:, :, :, 1::2]
    x_LL = x1 + x2 + x3 + x4
    x_HL = -x1 - x2 + x3 + x4
    x_LH = -x1 + x2 - x3 + x4
    x_HH = x1 - x2 - x3 + x4
    return jnp.concatenate((x_LL, x_HL, x_LH, x_HH), axis=1)


if __name__ == "__main__":
    key = jax.random.PRNGKey(0)
    x = jax.random.normal(key, (2, 4, 16, 16), dtype=jnp.float32)

    out = jax.block_until_ready(jax.jit(dwt_forward)(x))
    ref = dwt_reference(x)
    assert out.shape == (2, 16, 8, 8), out.shape
    assert jnp.allclose(out, ref, atol=1e-5, rtol=1e-5), "mismatch vs reference"

    # Non-divisible tile coverage (partial H tiles -> masked writeback) and
    # N=1 grid-collapse guard, with tiny tiles forced on purpose.
    x2 = jax.random.normal(jax.random.PRNGKey(1), (1, 3, 20, 24), jnp.float32)
    out2 = jax.block_until_ready(
        jax.jit(lambda v: dwt_forward(v, target_block_bytes=1024))(x2))
    ref2 = dwt_reference(x2)
    assert out2.shape == (1, 12, 10, 12), out2.shape
    assert jnp.allclose(out2, ref2, atol=1e-5, rtol=1e-5), "mismatch (partial tiles)"

    print("KERNEL_OK")
</pallas_src>

<mosaic_0001>
module attributes {stable_mosaic.version = 11 : i64} {
  func.func @dwt_kernel(%arg0: i32, %arg1: i32, %arg2: i32, %arg3: memref<1x4x8x32xf32, #tpu.memory_space<vmem>>, %arg4: memref<16x16xf32, #tpu.memory_space<vmem>>, %arg5: memref<1x4x4x8x8xf32, #tpu.memory_space<vmem>>) attributes {dimension_semantics = [#tpu.dimension_semantics<parallel>, #tpu.dimension_semantics<parallel>, #tpu.dimension_semantics<parallel>], iteration_bounds = array<i64: 2, 1, 1>, scalar_prefetch = 0 : i64, scratch_operands = 0 : i64, tpu.core_type = #tpu.core_type<tc>, window_params = [{transform_indices = @transform_0, window_bounds = array<i64: 1, 4, 8, 32>}, {pipeline_mode = #tpu.pipeline_mode<synchronous>, transform_indices = @transform_1, window_bounds = array<i64: 16, 16>}, {transform_indices = @transform_2, window_bounds = array<i64: 1, 4, 4, 8, 8>}]} {
    %c0 = arith.constant 0 : index
    %c0_0 = arith.constant 0 : index
    %0 = vector.load %arg4[%c0, %c0_0] : memref<16x16xf32, #tpu.memory_space<vmem>>, vector<16x16xf32>
    %c0_1 = arith.constant 0 : index
    %c0_2 = arith.constant 0 : index
    %c0_3 = arith.constant 0 : index
    %c0_4 = arith.constant 0 : index
    %1 = vector.load %arg3[%c0_1, %c0_2, %c0_3, %c0_4] : memref<1x4x8x32xf32, #tpu.memory_space<vmem>>, vector<1x4x8x16xf32>
    %2 = vector.shape_cast %1 : vector<1x4x8x16xf32> to vector<32x16xf32>
    %c0_5 = arith.constant 0 : index
    %c0_6 = arith.constant 0 : index
    %c0_7 = arith.constant 0 : index
    %c16 = arith.constant 16 : index
    %3 = vector.load %arg3[%c0_5, %c0_6, %c0_7, %c16] : memref<1x4x8x32xf32, #tpu.memory_space<vmem>>, vector<1x4x8x16xf32>
    %4 = vector.shape_cast %3 : vector<1x4x8x16xf32> to vector<32x16xf32>
    %cst = arith.constant dense<0.000000e+00> : vector<32x16xf32>
    %5 = tpu.matmul %2, %0, %cst {dimension_numbers = #tpu.dot_dimension_numbers<[1], [0], [0], [1], [0, 0, 1, 1], [], []>} : vector<32x16xf32>, vector<16x16xf32>, vector<32x16xf32> -> vector<32x16xf32>
    %cst_8 = arith.constant dense<0.000000e+00> : vector<32x16xf32>
    %6 = tpu.matmul %4, %0, %cst_8 {dimension_numbers = #tpu.dot_dimension_numbers<[1], [0], [0], [1], [0, 0, 1, 1], [], []>} : vector<32x16xf32>, vector<16x16xf32>, vector<32x16xf32> -> vector<32x16xf32>
    %7 = vector.extract_strided_slice %5 {offsets = [0, 0], sizes = [32, 8], strides = [1, 1]} : vector<32x16xf32> to vector<32x8xf32>
    %8 = vector.extract_strided_slice %5 {offsets = [0, 8], sizes = [32, 8], strides = [1, 1]} : vector<32x16xf32> to vector<32x8xf32>
    %9 = vector.extract_strided_slice %6 {offsets = [0, 0], sizes = [32, 8], strides = [1, 1]} : vector<32x16xf32> to vector<32x8xf32>
    %10 = vector.extract_strided_slice %6 {offsets = [0, 8], sizes = [32, 8], strides = [1, 1]} : vector<32x16xf32> to vector<32x8xf32>
    %11 = arith.addf %7, %9 : vector<32x8xf32>
    %12 = vector.shape_cast %11 : vector<32x8xf32> to vector<1x4x8x8xf32>
    %c0_9 = arith.constant 0 : index
    %c0_10 = arith.constant 0 : index
    %c0_11 = arith.constant 0 : index
    %c0_12 = arith.constant 0 : index
    %c0_13 = arith.constant 0 : index
    %13 = vector.load %arg5[%c0_9, %c0_10, %c0_11, %c0_12, %c0_13] : memref<1x4x4x8x8xf32, #tpu.memory_space<vmem>>, vector<1x1x4x8x8xf32>
    %14 = vector.shape_cast %13 : vector<1x1x4x8x8xf32> to vector<1x4x8x8xf32>
    %15 = vector.shape_cast %12 : vector<1x4x8x8xf32> to vector<1x1x4x8x8xf32>
    tpu.vector_store %arg5[%c0_9, %c0_10, %c0_11, %c0_12, %c0_13], %15 {strides = array<i32>} : memref<1x4x4x8x8xf32, #tpu.memory_space<vmem>>, vector<1x1x4x8x8xf32>,
    %16 = arith.addf %8, %10 : vector<32x8xf32>
    %17 = vector.shape_cast %16 : vector<32x8xf32> to vector<1x4x8x8xf32>
    %c0_14 = arith.constant 0 : index
    %c1 = arith.constant 1 : index
    %c0_15 = arith.constant 0 : index
    %c0_16 = arith.constant 0 : index
    %c0_17 = arith.constant 0 : index
    %18 = vector.load %arg5[%c0_14, %c1, %c0_15, %c0_16, %c0_17] : memref<1x4x4x8x8xf32, #tpu.memory_space<vmem>>, vector<1x1x4x8x8xf32>
    %19 = vector.shape_cast %18 : vector<1x1x4x8x8xf32> to vector<1x4x8x8xf32>
    %20 = vector.shape_cast %17 : vector<1x4x8x8xf32> to vector<1x1x4x8x8xf32>
    tpu.vector_store %arg5[%c0_14, %c1, %c0_15, %c0_16, %c0_17], %20 {strides = array<i32>} : memref<1x4x4x8x8xf32, #tpu.memory_space<vmem>>, vector<1x1x4x8x8xf32>,
    %21 = arith.subf %9, %7 : vector<32x8xf32>
    %22 = vector.shape_cast %21 : vector<32x8xf32> to vector<1x4x8x8xf32>
    %c0_18 = arith.constant 0 : index
    %c2 = arith.constant 2 : index
    %c0_19 = arith.constant 0 : index
    %c0_20 = arith.constant 0 : index
    %c0_21 = arith.constant 0 : index
    %23 = vector.load %arg5[%c0_18, %c2, %c0_19, %c0_20, %c0_21] : memref<1x4x4x8x8xf32, #tpu.memory_space<vmem>>, vector<1x1x4x8x8xf32>
    %24 = vector.shape_cast %23 : vector<1x1x4x8x8xf32> to vector<1x4x8x8xf32>
    %25 = vector.shape_cast %22 : vector<1x4x8x8xf32> to vector<1x1x4x8x8xf32>
    tpu.vector_store %arg5[%c0_18, %c2, %c0_19, %c0_20, %c0_21], %25 {strides = array<i32>} : memref<1x4x4x8x8xf32, #tpu.memory_space<vmem>>, vector<1x1x4x8x8xf32>,
    %26 = arith.subf %10, %8 : vector<32x8xf32>
    %27 = vector.shape_cast %26 : vector<32x8xf32> to vector<1x4x8x8xf32>
    %c0_22 = arith.constant 0 : index
    %c3 = arith.constant 3 : index
    %c0_23 = arith.constant 0 : index
    %c0_24 = arith.constant 0 : index
    %c0_25 = arith.constant 0 : index
    %28 = vector.load %arg5[%c0_22, %c3, %c0_23, %c0_24, %c0_25] : memref<1x4x4x8x8xf32, #tpu.memory_space<vmem>>, vector<1x1x4x8x8xf32>
    %29 = vector.shape_cast %28 : vector<1x1x4x8x8xf32> to vector<1x4x8x8xf32>
    %30 = vector.shape_cast %27 : vector<1x4x8x8xf32> to vector<1x1x4x8x8xf32>
    tpu.vector_store %arg5[%c0_22, %c3, %c0_23, %c0_24, %c0_25], %30 {strides = array<i32>} : memref<1x4x4x8x8xf32, #tpu.memory_space<vmem>>, vector<1x1x4x8x8xf32>,
    return
  }
  func.func @transform_0(%arg0: i32, %arg1: i32, %arg2: i32) -> (i32, i32, i32, i32) {
    %c0_i32 = arith.constant 0 : i32
    %c0_i32_0 = arith.constant 0 : i32
    return %arg0, %arg1, %arg2, %c0_i32 : i32, i32, i32, i32
  }
  func.func @transform_1(%arg0: i32, %arg1: i32, %arg2: i32) -> (i32, i32) {
    %c0_i32 = arith.constant 0 : i32
    %c0_i32_0 = arith.constant 0 : i32
    %c0_i32_1 = arith.constant 0 : i32
    return %c0_i32, %c0_i32_0 : i32, i32
  }
  func.func @transform_2(%arg0: i32, %arg1: i32, %arg2: i32) -> (i32, i32, i32, i32, i32) {
    %c0_i32 = arith.constant 0 : i32
    %c0_i32_0 = arith.constant 0 : i32
    %c0_i32_1 = arith.constant 0 : i32
    return %arg0, %c0_i32, %arg1, %arg2, %c0_i32_0 : i32, i32, i32, i32, i32
  }
}

</mosaic_0001>

<bundles_post_ra>
// kernel: dwt_forward.1
= control target key start
LH: loop header
LB: loop body
LE: loop exit
PB: predicated region body
PF: predicated region fallthrough
CT: control target
= control target key end

     0   :  { %s709_s9 = smov 0   ;;  %s711_s10 = smov 0   ;;  %s794_s0 = inlined_call_operand.vmem [shape: f32[2,4,8,32], index: 0, kind: input, shape index: {}]   ;;  %s795_s1 = inlined_call_operand.vmem [shape: f32[16,16], index: 1, kind: input, shape index: {}]   ;;  %s796_s2 = inlined_call_operand.vmem [shape: f32[2,4,4,8,8], index: 2, kind: output, shape index: {}]  }
   0x1   :  { %s713_s11 = smov 0  }
   0x2 LB: > { %s31_s12 = sadd.s32 1, %s686_s10  ;;  %p581_p0 = scmp.ge.s32.totalorder %s690_s11, 1  ;;  %s690_s11 = sphi %s713_s11, %s12_s11   ;;  %s686_s10 = sphi %s711_s10, %s798_s10   ;;  %s682_s9 = sphi %s709_s9, %s797_s9  }
   0x3   : > { %p33_p1 = scmp.ge.s32.totalorder %s31_s12, 2  ;;  %p147_p2 = scmp.lt.s32.totalorder %s690_s11, 3 }
   0x5   : > { %s800_s12 = smov (%p33_p1, %s31_s12), 0  ;;  %p148_p3 = pnand %p581_p0, %p147_p2 }
   0x6   : > { %p184_p4 = scmp.lt.s32.totalorder (!%p148_p3), %s682_s9, 1  ;;  %s692_s21 = smov (!%p148_p3), 112  }
   0x7   : > { %151 = sbr.rel (%p148_p3) target bundleno = 461 (0x1cd), region = 28  ;;  %s693_s26 = smov (!%p148_p3), 120  }
   0xc   : > { %v210_v0 = vld [vmem:[%s795_s1 + $0x8] sm:$0xff]  ;;  %v209_v1 = vld [vmem:[%s795_s1] sm:$0xff]  ;;  %s802_s9 = smov (!%p184_p4, %s682_s9), 1  ;;  %vm215_vm0 = vcmask 130048   ;;  %vm418_vm1 = vcmask 64512  }
   0xd   : > { %622 = vmatprep.subr.mxu0 %v210_v0  ;;  %632 = vmatprep.subr.mxu1 %v210_v0  ;;  %s608_s17 = sshll.u32 %s802_s9, 5  ;;  %s609_s22 = sshll.u32 %s802_s9, 7 }
   0xe   : > { %623 = vmatpush3.msra.mxu0 %v210_v0  ;;  %633 = vmatpush3.msra.mxu1 %v210_v0  ;;  %s194_s20 = scalar_lea.vmem %s794_s0, %s608_s17  ;;  %s751_s25 = scalar_lea.vmem %s796_s2, %s609_s22 }
   0xf   : > { %624 = vmatprep.subr.mxu0 %v209_v1  ;;  %634 = vmatprep.subr.mxu1 %v209_v1  ;;  %v211_v2 = vld [vmem:[%s194_s20] sm:$0xff]  ;;  %v213_v3 = vld [vmem:[%s194_s20 + $0x10] sm:$0xff]  ;;  %v212_v4 = vld [vmem:[%s194_s20 + $0x8] sm:$0xff] }
  0x10   : > { %625 = vmatpush3.msra.mxu0 %v209_v1  ;;  %635 = vmatpush3.msra.mxu1 %v209_v1  ;;  %v214_v5 = vld [vmem:[%s194_s20 + $0x18] sm:$0xff] }
  0x11   : > { %313 = vrot.lane.b32.xlu0 %v211_v2, %s692_s21  ;;  %317 = vrot.lane.b32.xlu1 %v213_v3, %s692_s21 }
  0x12   : > { %626 = vmatprep.mubr.msk.f32.mxu0 %vm215_vm0, %v211_v2 }
  0x13   : > { %627 = vmatmul.mubr.msk.f32.vlgmr.msra.gmra.mxu0 %vm215_vm0, %v212_v4 }
  0x14   : > { %629 = vmatprep.mubr.msk.f32.mxu0 %vm215_vm0, %v213_v3 }
  0x15   : > { %315 = vrot.lane.b32.xlu0 %v212_v4, %s692_s21  ;;  %319 = vrot.lane.b32.xlu1 %v214_v5, %s692_s21 }
  0x17   : > { %630 = vmatmul.mubr.msk.f32.gmra.mxu0 %vm215_vm0, %v214_v5 }
  0x83   : > { %v314_v6 = vpop.permute.xlu0 %313  ;;  %v318_v7 = vpop.permute.xlu1 %317 }
  0x84   : > { %636 = vmatprep.mubr.msk.f32.mxu1 %vm215_vm0, %v314_v6 }
  0x87   : > { %v316_v8 = vpop.permute.xlu0 %315  ;;  %v320_v9 = vpop.permute.xlu1 %319 }
  0x88   : > { %637 = vmatmul.mubr.msk.f32.vlgmr.msra.gmra.mxu1 %vm215_vm0, %v316_v8 }
  0x89   : > { %639 = vmatprep.mubr.msk.f32.mxu1 %vm215_vm0, %v318_v7 }
  0x8c   : > { %640 = vmatmul.mubr.msk.f32.gmra.mxu1 %vm215_vm0, %v320_v9 }
  0xd3   : > { %v628_v10 = vpop.f32.mrf.mxu0 }
  0xd5   : > { %v294_v11 = vpop.f32.mrf.mxu0 }
  0xd7   : > { %v631_v13 = vpop.f32.mrf.mxu0 }
  0xd9   : > { %v304_v20 = vpop.f32.mrf.mxu0 }
 0x148   : > { %v638_v12 = vpop.f32.mrf.mxu1 }
 0x149   : > { %v415_v14 = vadd.f32 %v638_v12, %v628_v10  ;;  %v445_v15 = vsub.f32 %v638_v12, %v628_v10 }
 0x14a   : > { %v395_v16 = vpop.f32.mrf.mxu1 }
 0x14b   : > { %420 = vst.msk [vmem:[%s751_s25 + $0x8] sm:$0xff] %vm418_vm1, %v415_v14  ;;  %599 = vst.msk [vmem:[%s751_s25 + $0x48] sm:$0xff] %vm418_vm1, %v445_v15  ;;  %v414_v17 = vadd.f32 %v395_v16, %v294_v11  ;;  %v444_v18 = vsub.f32 %v395_v16, %v294_v11  ;;  %429 = vrot.lane.b32.xlu1 %v415_v14, %s693_s26 }
 0x14c   : > { %v641_v19 = vpop.f32.mrf.mxu1 }
 0x14d   : > { %419 = vst.msk [vmem:[%s751_s25] sm:$0xff] %vm418_vm1, %v414_v17  ;;  %598 = vst.msk [vmem:[%s751_s25 + $0x40] sm:$0xff] %vm418_vm1, %v444_v18  ;;  %427 = vrot.lane.b32.xlu0 %v414_v17, %s693_s26  ;;  %v417_v21 = vadd.f32 %v641_v19, %v631_v13  ;;  %v447_v22 = vsub.f32 %v641_v19, %v631_v13 }
 0x14e   : > { %v405_v23 = vpop.f32.mrf.mxu1 }
 0x14f   : > { %422 = vst.msk [vmem:[%s751_s25 + $0x18] sm:$0xff] %vm418_vm1, %v417_v21  ;;  %601 = vst.msk [vmem:[%s751_s25 + $0x58] sm:$0xff] %vm418_vm1, %v447_v22  ;;  %459 = vrot.lane.b32.xlu1 %v445_v15, %s693_s26  ;;  %v416_v24 = vadd.f32 %v405_v23, %v304_v20  ;;  %v446_v25 = vsub.f32 %v405_v23, %v304_v20 }
 0x151   : > { %421 = vst.msk [vmem:[%s751_s25 + $0x10] sm:$0xff] %vm418_vm1, %v416_v24  ;;  %600 = vst.msk [vmem:[%s751_s25 + $0x50] sm:$0xff] %vm418_vm1, %v446_v25  ;;  %457 = vrot.lane.b32.xlu0 %v444_v18, %s693_s26 }
 0x153   : > { %433 = vrot.lane.b32.xlu1 %v417_v21, %s693_s26 }
 0x155   : > { %431 = vrot.lane.b32.xlu0 %v416_v24, %s693_s26 }
 0x157   : > { %463 = vrot.lane.b32.xlu1 %v447_v22, %s693_s26 }
 0x159   : > { %461 = vrot.lane.b32.xlu0 %v446_v25, %s693_s26 }
 0x1bd   : > { %v430_v26 = vpop.permute.xlu1 %429 }
 0x1be   : > { %595 = vst.msk [vmem:[%s751_s25 + $0x28] sm:$0xff] %vm418_vm1, %v430_v26 }
 0x1bf   : > { %v428_v27 = vpop.permute.xlu0 %427 }
 0x1c0   : > { %594 = vst.msk [vmem:[%s751_s25 + $0x20] sm:$0xff] %vm418_vm1, %v428_v27 }
 0x1c1   : > { %v460_v28 = vpop.permute.xlu1 %459 }
 0x1c2   : > { %603 = vst.msk [vmem:[%s751_s25 + $0x68] sm:$0xff] %vm418_vm1, %v460_v28 }
 0x1c3   : > { %v458_v29 = vpop.permute.xlu0 %457 }
 0x1c4   : > { %602 = vst.msk [vmem:[%s751_s25 + $0x60] sm:$0xff] %vm418_vm1, %v458_v29 }
 0x1c5   : > { %v434_v30 = vpop.permute.xlu1 %433 }
 0x1c6   : > { %597 = vst.msk [vmem:[%s751_s25 + $0x38] sm:$0xff] %vm418_vm1, %v434_v30 }
 0x1c7   : > { %v432_v31 = vpop.permute.xlu0 %431 }
 0x1c8   : > { %596 = vst.msk [vmem:[%s751_s25 + $0x30] sm:$0xff] %vm418_vm1, %v432_v31 }
 0x1c9   : > { %v464_v32 = vpop.permute.xlu1 %463 }
 0x1ca   : > { %605 = vst.msk [vmem:[%s751_s25 + $0x78] sm:$0xff] %vm418_vm1, %v464_v32 }
 0x1cb   : > { %v462_v33 = vpop.permute.xlu0 %461 }
 0x1cc   : > { %604 = vst.msk [vmem:[%s751_s25 + $0x70] sm:$0xff] %vm418_vm1, %v462_v33 }
 0x1cd PF: > { %s12_s11 = sadd.s32 1, %s690_s11   ;;  %s797_s9 = smov %s686_s10 }
 0x1ce   : > { %p9_p5 = scmp.ge.s32.totalorder %s12_s11, 4   ;;  %s798_s10 = smov %s800_s12 }
 0x1d0   :  { %11 = sbr.rel (!%p9_p5) target bundleno = 2 (0x2), region = 61 }

</bundles_post_ra>
